<compile_context>
chip_gen: v5e
topology: v5e:2x2
jax: 0.10.0
libtpu: 0.0.40
codegen_flags: <defaults>
</compile_context>

<pallas_src>
import functools

import jax
import jax.numpy as jnp
import numpy as np
from jax.experimental import pallas as pl
from jax.experimental.pallas import tpu as pltpu


# ----------------------------------------------------------------------------
# Tiling helpers
# ----------------------------------------------------------------------------
def _row_tile(rows, max_rows=1024):
    """Row tile for the input-projection matmul (must divide rows; %8 if partial)."""
    if rows <= max_rows:
        return rows
    for cand in range(max_rows, 7, -1):
        if rows % cand == 0 and cand % 8 == 0:
            return cand
    return rows


def _time_chunk(T, max_chunk=32):
    """Largest divisor of T that is <= max_chunk (time steps per grid step)."""
    for cand in range(min(T, max_chunk), 0, -1):
        if T % cand == 0:
            return cand
    return 1


# ----------------------------------------------------------------------------
# Kernel 1: hoisted input projection  G_x = X @ W_ih^T + bias   (one big matmul)
# ----------------------------------------------------------------------------
def _input_proj_kernel(x_ref, w_ref, b_ref, gx_ref):
    # x_ref: (RT, D)   w_ref: (D, 4H)   b_ref: (1, 4H)   gx_ref: (RT, 4H)
    gx_ref[...] = (
        jnp.dot(x_ref[...], w_ref[...], preferred_element_type=jnp.float32)
        + b_ref[...]
    )


def _input_projection(x_tbd, w_ih, bias_row):
    """x_tbd: (T, B, Din) f32, w_ih: (4H, Din), bias_row: (1, 4H) -> (T, B, 4H)."""
    T, B, D = x_tbd.shape
    G = w_ih.shape[0]                                   # 4H
    rows = T * B
    rt = _row_tile(rows)

    x2 = x_tbd.reshape(rows, D)
    wih_t = jnp.asarray(w_ih, jnp.float32).T            # (Din, 4H)

    gx = pl.pallas_call(
        _input_proj_kernel,
        out_shape=jax.ShapeDtypeStruct((rows, G), jnp.float32),
        grid_spec=pltpu.PrefetchScalarGridSpec(
            num_scalar_prefetch=0,
            grid=(rows // rt,),
            in_specs=[
                pl.BlockSpec((rt, D), lambda r: (r, 0)),     # X rows
                pl.BlockSpec((D, G), lambda r: (0, 0)),      # W_ih^T (resident)
                pl.BlockSpec((1, G), lambda r: (0, 0)),      # bias   (resident)
            ],
            out_specs=pl.BlockSpec((rt, G), lambda r: (r, 0)),
        ),
        compiler_params=pltpu.CompilerParams(
            dimension_semantics=("parallel",)),
    )(x2, wih_t, bias_row)
    return gx.reshape(T, B, G)


# ----------------------------------------------------------------------------
# Kernel 2: the sequential recurrence (only h_{t-1} @ W_hh^T left inside)
# ----------------------------------------------------------------------------
def _lstm_recurrent_kernel(gx_ref, whh_ref, y_ref, h_out_ref, c_out_ref,
                           h_scr, c_scr, *, chunk, hidden, reverse):
    """Grid axis 0 = time chunks (sequential).

    gx_ref : (chunk, B, 4H)  precomputed input gates for this time chunk
    whh_ref: (H, 4H)         recurrent weight (transposed, resident)
    y_ref  : (chunk, B, H)   per-step hidden output (input to next layer)
    h_out_ref / c_out_ref: (B, H) final states (written once, last chunk)
    h_scr / c_scr        : (B, H) VMEM carry
    """
    c_idx = pl.program_id(0)
    last = pl.num_programs(0) - 1

    @pl.when(c_idx == 0)
    def _():
        h_scr[...] = jnp.zeros_like(h_scr)
        c_scr[...] = jnp.zeros_like(c_scr)

    whh = whh_ref[...]                                   # load once per chunk

    def step(s, carry):
        h_prev, c_prev = carry
        # Reverse direction walks the chunk back-to-front; the chunk itself is
        # delivered in reversed order by the index_map, so the recurrence sees
        # original time T-1 ... 0 without any HBM-side reversal.
        t = (chunk - 1 - s) if reverse else s
        gates = gx_ref[t] + jnp.dot(h_prev, whh,
                                    preferred_element_type=jnp.float32)
        i = jax.nn.sigmoid(gates[:, 0 * hidden:1 * hidden])
        f = jax.nn.sigmoid(gates[:, 1 * hidden:2 * hidden])
        g = jnp.tanh(gates[:, 2 * hidden:3 * hidden])
        o = jax.nn.sigmoid(gates[:, 3 * hidden:4 * hidden])
        c_new = f * c_prev + i * g
        h_new = o * jnp.tanh(c_new)
        y_ref[t] = h_new.astype(y_ref.dtype)
        return h_new, c_new

    h_f, c_f = jax.lax.fori_loop(0, chunk, step,
                                 (h_scr[...], c_scr[...]), unroll=True)
    h_scr[...] = h_f
    c_scr[...] = c_f

    @pl.when(c_idx == last)
    def _():
        h_out_ref[...] = h_f.astype(h_out_ref.dtype)
        c_out_ref[...] = c_f.astype(c_out_ref.dtype)


def _lstm_recurrence(gx, w_hh, *, reverse=False, max_chunk=32):
    """gx: (T, B, 4H) f32, w_hh: (4H, H).  Returns (y, h_final, c_final)."""
    T, B, G = gx.shape
    H = w_hh.shape[1]
    whh_t = jnp.asarray(w_hh, jnp.float32).T             # (H, 4H)

    tc = _time_chunk(T, max_chunk)
    nchunks = T // tc

    if reverse:
        time_map = lambda c: (nchunks - 1 - c, 0, 0)
    else:
        time_map = lambda c: (c, 0, 0)

    kernel = functools.partial(_lstm_recurrent_kernel,
                               chunk=tc, hidden=H, reverse=reverse)

    y, h_f, c_f = pl.pallas_call(
        kernel,
        out_shape=(
            jax.ShapeDtypeStruct((T, B, H), jnp.float32),   # y
            jax.ShapeDtypeStruct((B, H), jnp.float32),      # h_final
            jax.ShapeDtypeStruct((B, H), jnp.float32),      # c_final
        ),
        grid_spec=pltpu.PrefetchScalarGridSpec(
            num_scalar_prefetch=0,
            grid=(nchunks,),
            in_specs=[
                pl.BlockSpec((tc, B, G), time_map),          # G_x chunk
                pl.BlockSpec((H, G), lambda c: (0, 0)),      # W_hh^T (resident)
            ],
            out_specs=[
                pl.BlockSpec((tc, B, H), time_map),          # y chunk
                pl.BlockSpec((B, H), lambda c: (0, 0)),      # h_final (resident)
                pl.BlockSpec((B, H), lambda c: (0, 0)),      # c_final (resident)
            ],
            scratch_shapes=[
                pltpu.VMEM((B, H), jnp.float32),             # h carry
                pltpu.VMEM((B, H), jnp.float32),             # c carry
            ],
        ),
        compiler_params=pltpu.CompilerParams(
            dimension_semantics=("arbitrary",)),             # time is sequential
    )(gx, whh_t)
    return y, h_f, c_f


# ----------------------------------------------------------------------------
# Parameters + encoder forward (matches nn.LSTM / Encoder semantics)
# ----------------------------------------------------------------------------
def init_lstm_params(key, input_size, hidden_size, num_layers, bidirectional):
    """Deterministic init mirroring nn.LSTM parameter shapes (uniform +-1/sqrt(H))."""
    num_dirs = 2 if bidirectional else 1
    k = 1.0 / np.sqrt(hidden_size)
    params = []
    for layer in range(num_layers):
        layer_in = input_size if layer == 0 else hidden_size * num_dirs
        for _ in range(num_dirs):
            key, k1, k2, k3, k4 = jax.random.split(key, 5)
            params.append(dict(
                w_ih=jax.random.uniform(k1, (4 * hidden_size, layer_in),
                                        jnp.float32, -k, k),
                w_hh=jax.random.uniform(k2, (4 * hidden_size, hidden_size),
                                        jnp.float32, -k, k),
                b_ih=jax.random.uniform(k3, (4 * hidden_size,),
                                        jnp.float32, -k, k),
                b_hh=jax.random.uniform(k4, (4 * hidden_size,),
                                        jnp.float32, -k, k),
            ))
    return params


def encoder_forward(x_btd, params, num_layers, hidden_size, bidirectional=False):
    """Equivalent of Encoder.forward: returns (hidden, cell),
    each (num_layers * num_dirs, B, hidden_size), PyTorch layer/direction order."""
    num_dirs = 2 if bidirectional else 1
    x = jnp.transpose(jnp.asarray(x_btd, jnp.float32), (1, 0, 2))   # (T, B, D)

    h_list, c_list = [], []
    layer_in = x
    p_idx = 0
    for _ in range(num_layers):
        dir_outputs = []
        for d in range(num_dirs):
            p = params[p_idx]; p_idx += 1
            bias_row = (jnp.asarray(p["b_ih"], jnp.float32)
                        + jnp.asarray(p["b_hh"], jnp.float32)).reshape(1, -1)
            # (1) one big MXU matmul for the input projection (all T*B rows)
            gx = _input_projection(layer_in, p["w_ih"], bias_row)
            # (2) sequential recurrence; reverse handled inside the kernel
            y, h_f, c_f = _lstm_recurrence(gx, p["w_hh"], reverse=(d == 1))
            dir_outputs.append(y)
            h_list.append(h_f)
            c_list.append(c_f)
        layer_in = (dir_outputs[0] if num_dirs == 1
                    else jnp.concatenate(dir_outputs, axis=-1))

    hidden = jnp.stack(h_list, axis=0)   # (num_layers * num_dirs, B, H)
    cell = jnp.stack(c_list, axis=0)
    return hidden, cell


# ---- pure-JAX reference (correctness sanity check) --------------------------
def _ref_lstm_layer(x_tbd, w_ih, w_hh, b_ih, b_hh):
    T, B, _ = x_tbd.shape
    H = w_hh.shape[1]

    def step(carry, xt):
        h, c = carry
        gates = xt @ w_ih.T + h @ w_hh.T + b_ih + b_hh
        i = jax.nn.sigmoid(gates[:, 0 * H:1 * H])
        f = jax.nn.sigmoid(gates[:, 1 * H:2 * H])
        g = jnp.tanh(gates[:, 2 * H:3 * H])
        o = jax.nn.sigmoid(gates[:, 3 * H:4 * H])
        c = f * c + i * g
        h = o * jnp.tanh(c)
        return (h, c), h

    (h_f, c_f), y = jax.lax.scan(step,
                                 (jnp.zeros((B, H)), jnp.zeros((B, H))),
                                 x_tbd)
    return y, h_f, c_f


def _ref_encoder(x_btd, params, num_layers, hidden_size, bidirectional=False):
    num_dirs = 2 if bidirectional else 1
    x = jnp.transpose(x_btd, (1, 0, 2))
    h_list, c_list = [], []
    layer_in = x
    p_idx = 0
    for _ in range(num_layers):
        outs = []
        for d in range(num_dirs):
            p = params[p_idx]; p_idx += 1
            xin = layer_in if d == 0 else layer_in[::-1]
            y, h_f, c_f = _ref_lstm_layer(xin, p["w_ih"], p["w_hh"],
                                          p["b_ih"], p["b_hh"])
            if d == 1:
                y = y[::-1]
            outs.append(y)
            h_list.append(h_f)
            c_list.append(c_f)
        layer_in = outs[0] if num_dirs == 1 else jnp.concatenate(outs, axis=-1)
    return jnp.stack(h_list), jnp.stack(c_list)


if __name__ == "__main__":
    # Shapes consistent with Encoder(input_size=4, hidden_size=32, num_layers=2);
    # x is (batch, seq, input_size).
    B, T, D, H, L = 2, 8, 4, 32, 2

    key = jax.random.PRNGKey(0)
    kx, kp, kp2 = jax.random.split(key, 3)
    x = jax.random.normal(kx, (B, T, D), jnp.float32)

    # --- unidirectional (the module's default) ---
    params = init_lstm_params(kp, D, H, L, bidirectional=False)
    hidden, cell = encoder_forward(x, params, num_layers=L, hidden_size=H,
                                   bidirectional=False)
    jax.block_until_ready((hidden, cell))
    assert hidden.shape == (L, B, H) and cell.shape == (L, B, H)
    h_ref, c_ref = _ref_encoder(x, params, L, H, bidirectional=False)
    np.testing.assert_allclose(np.asarray(hidden), np.asarray(h_ref),
                               atol=1e-2, rtol=1e-2)
    np.testing.assert_allclose(np.asarray(cell), np.asarray(c_ref),
                               atol=1e-2, rtol=1e-2)

    # --- bidirectional (exercises the in-kernel reverse path) ---
    params_bi = init_lstm_params(kp2, D, H, L, bidirectional=True)
    hidden_bi, cell_bi = encoder_forward(x, params_bi, num_layers=L,
                                         hidden_size=H, bidirectional=True)
    jax.block_until_ready((hidden_bi, cell_bi))
    assert hidden_bi.shape == (2 * L, B, H) and cell_bi.shape == (2 * L, B, H)
    h_ref_bi, c_ref_bi = _ref_encoder(x, params_bi, L, H, bidirectional=True)
    np.testing.assert_allclose(np.asarray(hidden_bi), np.asarray(h_ref_bi),
                               atol=1e-2, rtol=1e-2)
    np.testing.assert_allclose(np.asarray(cell_bi), np.asarray(c_ref_bi),
                               atol=1e-2, rtol=1e-2)

    print("KERNEL_OK")
</pallas_src>

<mosaic_0001>
module attributes {stable_mosaic.version = 11 : i64} {
  func.func @_input_proj_kernel(%arg0: i32, %arg1: memref<16x4xf32, #tpu.memory_space<vmem>>, %arg2: memref<4x128xf32, #tpu.memory_space<vmem>>, %arg3: memref<1x128xf32, #tpu.memory_space<vmem>>, %arg4: memref<16x128xf32, #tpu.memory_space<vmem>>) attributes {dimension_semantics = [#tpu.dimension_semantics<parallel>], iteration_bounds = array<i64: 1>, scalar_prefetch = 0 : i64, scratch_operands = 0 : i64, tpu.core_type = #tpu.core_type<tc>, window_params = [{transform_indices = @transform_0, window_bounds = array<i64: 16, 4>}, {pipeline_mode = #tpu.pipeline_mode<synchronous>, transform_indices = @transform_1, window_bounds = array<i64: 4, 128>}, {pipeline_mode = #tpu.pipeline_mode<synchronous>, transform_indices = @transform_2, window_bounds = array<i64: 1, 128>}, {transform_indices = @transform_3, window_bounds = array<i64: 16, 128>}]} {
    %c0 = arith.constant 0 : index
    %c0_0 = arith.constant 0 : index
    %0 = vector.load %arg1[%c0, %c0_0] : memref<16x4xf32, #tpu.memory_space<vmem>>, vector<16x4xf32>
    %c0_1 = arith.constant 0 : index
    %c0_2 = arith.constant 0 : index
    %1 = vector.load %arg2[%c0_1, %c0_2] : memref<4x128xf32, #tpu.memory_space<vmem>>, vector<4x128xf32>
    %cst = arith.constant dense<0.000000e+00> : vector<16x128xf32>
    %2 = tpu.matmul %0, %1, %cst {dimension_numbers = #tpu.dot_dimension_numbers<[1], [0], [0], [1], [0, 0, 1, 1], [], []>} : vector<16x4xf32>, vector<4x128xf32>, vector<16x128xf32> -> vector<16x128xf32>
    %c0_3 = arith.constant 0 : index
    %c0_4 = arith.constant 0 : index
    %3 = vector.load %arg3[%c0_3, %c0_4] : memref<1x128xf32, #tpu.memory_space<vmem>>, vector<1x128xf32>
    %4 = vector.broadcast %3 : vector<1x128xf32> to vector<16x128xf32>
    %5 = arith.addf %2, %4 : vector<16x128xf32>
    %c0_5 = arith.constant 0 : index
    %c0_6 = arith.constant 0 : index
    %6 = vector.load %arg4[%c0_5, %c0_6] : memref<16x128xf32, #tpu.memory_space<vmem>>, vector<16x128xf32>
    tpu.vector_store %arg4[%c0_5, %c0_6], %5 {strides = array<i32>} : memref<16x128xf32, #tpu.memory_space<vmem>>, vector<16x128xf32>,
    return
  }
  func.func @transform_0(%arg0: i32) -> (i32, i32) {
    %c0_i32 = arith.constant 0 : i32
    %c0_i32_0 = arith.constant 0 : i32
    return %arg0, %c0_i32 : i32, i32
  }
  func.func @transform_1(%arg0: i32) -> (i32, i32) {
    %c0_i32 = arith.constant 0 : i32
    %c0_i32_0 = arith.constant 0 : i32
    %c0_i32_1 = arith.constant 0 : i32
    return %c0_i32, %c0_i32_0 : i32, i32
  }
  func.func @transform_2(%arg0: i32) -> (i32, i32) {
    %c0_i32 = arith.constant 0 : i32
    %c0_i32_0 = arith.constant 0 : i32
    %c0_i32_1 = arith.constant 0 : i32
    return %c0_i32, %c0_i32_0 : i32, i32
  }
  func.func @transform_3(%arg0: i32) -> (i32, i32) {
    %c0_i32 = arith.constant 0 : i32
    %c0_i32_0 = arith.constant 0 : i32
    return %arg0, %c0_i32 : i32, i32
  }
}

</mosaic_0001>

<bundles_post_ra>
// kernel: tpu_custom_call.1
= control target key start
LH: loop header
LB: loop body
LE: loop exit
PB: predicated region body
PF: predicated region fallthrough
CT: control target
= control target key end

     0   :  { %vm29_vm0 = vcmask 1043456   ;;  %vm22_vm1 = vcmask 31744   ;;  %s148_s0 = inlined_call_operand.vmem [shape: f32[16,4], index: 0, kind: input, shape index: {}]   ;;  %s149_s1 = inlined_call_operand.vmem [shape: f32[4,128], index: 1, kind: input, shape index: {}]   ;;  %s150_s2 = inlined_call_operand.vmem [shape: f32[1,128], index: 2, kind: input, shape index: {}]   ;;  %s151_s3 = inlined_call_operand.hbm [shape: f32[16,128], index: 3, kind: output, shape index: {}]  }
   0x1   :  { %v17_v0 = vld [vmem:[%s149_s1] sm:$0xf]  ;;  %v16_v2 = vld [vmem:[%s148_s0 + $0x8] sm:$0xff] }
   0x2   :  { %v15_v1 = vld [vmem:[%s148_s0] sm:$0xff]  ;;  %76 = vmatpush.msk.msra.mxu0 %vm29_vm0, %v17_v0  ;;  %79 = vmatpush.msk.msra.mxu1 %vm29_vm0, %v17_v0 }
   0x3   :  { %8 = vsyncpa [#allocation3], 0  ;;  %77 = vmatmul.msk.f32.vlgmr.msra.gmra.mxu0 %vm22_vm1, %v15_v1  ;;  %78 = vmatmul.msk.f32.vlgmr.msra.gmra.mxu1 %vm22_vm1, %v16_v2  ;;  %v83_v3 = vld [vmem:[%s150_s2] ss:$0 sm:$0xff]  ;;  %s110_s1 = smov [#allocation2]   ;;  %s64_s23 = sshll.u32 %s151_s3, 4  ;;  %s65_s23 = int_to_ptr.hbm [resolvable:$true] %s64_s23 }
   0x4   :  { %s62_s20 = sshll.u32 %s110_s1, 4  ;;  %s111_s0 = smov 128   ;;  %s63_s20 = int_to_ptr.vmem [resolvable:$true] %s62_s20 }
   0x5   :  { %s112_s24 = smov 8  }
  0x80   :  { %v50_v4 = vpop.f32.mrf.mxu0  ;;  %v53_v5 = vpop.f32.mrf.mxu1 }
  0x81   :  { %v51_v6 = vadd.f32 %v83_v3, %v50_v4  ;;  %v54_v7 = vadd.f32 %v83_v3, %v53_v5 }
  0x83   :  { %56 = vst [vmem:[#allocation2] sm:$0xff] %v51_v6 }
  0x84   :  { %57 = vst [vmem:[#allocation2 + $0x8] sm:$0xff] %v54_v7 }
  0x85   :  { %70 = dma.vmem_to_hbm [thread:$0]  %s63_s20, 256, %s65_s23, [#allocation3], %s111_s0, %s111_s0, %s112_s24  }
  0x86   :  { %108 = dma.done.wait [#allocation3], 256  }
  0x87   :  { %109 = vsyncadd [#allocation3], 4294967040 }
  0x88   :  { %75 = vsyncpa [#allocation3], 1 }

</bundles_post_ra>
